<compile_context>
chip_gen: v5e
topology: v5e:2x2
jax: 0.10.0
libtpu: 0.0.40
codegen_flags: <defaults>
</compile_context>

<pallas_src>
import jax
import jax.numpy as jnp
from jax.experimental import pallas as pl
from jax.experimental.pallas import tpu as pltpu


def _bi_interaction_kernel(x_ref, o_ref):
    # x_ref block: (TB, F, E) ; o_ref block: (TB, E)
    num_fields = x_ref.shape[1]

    row = x_ref[:, 0, :].astype(jnp.float32)          # (TB, E)
    s = row                                           # running sum over F
    sq = row * row                                    # running sum of squares
    for f in range(1, num_fields):                    # F is small & static
        row = x_ref[:, f, :].astype(jnp.float32)
        s = s + row
        sq = sq + row * row

    o_ref[...] = (0.5 * (s * s - sq)).astype(o_ref.dtype)


def _round_up(a, m):
    return ((a + m - 1) // m) * m


def bi_interaction(x, *, target_tile_bytes=4 << 20, max_tb=2048):
    """x: (B, F, E) -> (B, 1, E), matching BiInteraction.forward semantics."""
    B, F, E = x.shape
    bytes_per_row = F * E * x.dtype.itemsize

    # Pick a batch tile TB: a few-MiB input tile, multiple of 8 sublanes,
    # capped so tiny test batches don't over-pad.
    tb = max(8, min(max_tb, target_tile_bytes // bytes_per_row))
    tb = (tb // 8) * 8
    tb = min(tb, _round_up(B, 8))

    b_pad = _round_up(B, tb)
    if b_pad != B:
        x = jnp.pad(x, ((0, b_pad - B), (0, 0), (0, 0)))

    out2d = pl.pallas_call(
        _bi_interaction_kernel,
        out_shape=jax.ShapeDtypeStruct((b_pad, E), x.dtype),
        grid=(b_pad // tb,),
        in_specs=[pl.BlockSpec((tb, F, E), lambda i: (i, 0, 0))],
        out_specs=pl.BlockSpec((tb, E), lambda i: (i, 0)),
        compiler_params=pltpu.CompilerParams(
            dimension_semantics=("parallel",),
            vmem_limit_bytes=32 * 1024 * 1024,
        ),
    )(x)

    return out2d[:B].reshape(B, 1, E)


def bi_interaction_ref(x):
    """Pure-JAX reference, mirrors the PyTorch forward exactly."""
    square_of_sum = jnp.sum(x, axis=1, keepdims=True) ** 2
    sum_of_square = jnp.sum(x * x, axis=1, keepdims=True)
    return 0.5 * (square_of_sum - sum_of_square)


if __name__ == "__main__":
    key = jax.random.PRNGKey(0)
    B, F, E = 2, 4, 32  # batch, field_size, embedding_size
    x = jax.random.normal(key, (B, F, E), dtype=jnp.float32)

    out = bi_interaction(x)
    out = jax.block_until_ready(out)

    ref = bi_interaction_ref(x)
    assert out.shape == (B, 1, E), out.shape
    assert jnp.allclose(out, ref, atol=1e-5, rtol=1e-5), "mismatch vs reference"

    print("KERNEL_OK")
</pallas_src>

<mosaic_0001>
module attributes {stable_mosaic.version = 11 : i64} {
  func.func @_bi_interaction_kernel(%arg0: i32, %arg1: memref<8x4x32xf32, #tpu.memory_space<vmem>>, %arg2: memref<8x32xf32, #tpu.memory_space<vmem>>) attributes {dimension_semantics = [#tpu.dimension_semantics<parallel>], iteration_bounds = array<i64: 1>, scalar_prefetch = 0 : i64, scratch_operands = 0 : i64, tpu.core_type = #tpu.core_type<tc>, window_params = [{transform_indices = @transform_0, window_bounds = array<i64: 8, 4, 32>}, {transform_indices = @transform_1, window_bounds = array<i64: 8, 32>}]} {
    %c0 = arith.constant 0 : index
    %c0_0 = arith.constant 0 : index
    %c0_1 = arith.constant 0 : index
    %0 = vector.load %arg1[%c0, %c0_0, %c0_1] : memref<8x4x32xf32, #tpu.memory_space<vmem>>, vector<8x1x32xf32>
    %1 = vector.shape_cast %0 : vector<8x1x32xf32> to vector<8x32xf32>
    %2 = arith.mulf %1, %1 : vector<8x32xf32>
    %c0_2 = arith.constant 0 : index
    %c1 = arith.constant 1 : index
    %c0_3 = arith.constant 0 : index
    %3 = vector.load %arg1[%c0_2, %c1, %c0_3] : memref<8x4x32xf32, #tpu.memory_space<vmem>>, vector<8x1x32xf32>
    %4 = vector.shape_cast %3 : vector<8x1x32xf32> to vector<8x32xf32>
    %5 = arith.addf %1, %4 : vector<8x32xf32>
    %6 = arith.mulf %4, %4 : vector<8x32xf32>
    %7 = arith.addf %2, %6 : vector<8x32xf32>
    %c0_4 = arith.constant 0 : index
    %c2 = arith.constant 2 : index
    %c0_5 = arith.constant 0 : index
    %8 = vector.load %arg1[%c0_4, %c2, %c0_5] : memref<8x4x32xf32, #tpu.memory_space<vmem>>, vector<8x1x32xf32>
    %9 = vector.shape_cast %8 : vector<8x1x32xf32> to vector<8x32xf32>
    %10 = arith.addf %5, %9 : vector<8x32xf32>
    %11 = arith.mulf %9, %9 : vector<8x32xf32>
    %12 = arith.addf %7, %11 : vector<8x32xf32>
    %c0_6 = arith.constant 0 : index
    %c3 = arith.constant 3 : index
    %c0_7 = arith.constant 0 : index
    %13 = vector.load %arg1[%c0_6, %c3, %c0_7] : memref<8x4x32xf32, #tpu.memory_space<vmem>>, vector<8x1x32xf32>
    %14 = vector.shape_cast %13 : vector<8x1x32xf32> to vector<8x32xf32>
    %15 = arith.addf %10, %14 : vector<8x32xf32>
    %16 = arith.mulf %14, %14 : vector<8x32xf32>
    %17 = arith.addf %12, %16 : vector<8x32xf32>
    %18 = arith.mulf %15, %15 : vector<8x32xf32>
    %19 = arith.subf %18, %17 : vector<8x32xf32>
    %cst = arith.constant 5.000000e-01 : f32
    %20 = vector.broadcast %cst : f32 to vector<8x32xf32>
    %21 = arith.mulf %20, %19 : vector<8x32xf32>
    %c0_8 = arith.constant 0 : index
    %c0_9 = arith.constant 0 : index
    %22 = vector.load %arg2[%c0_8, %c0_9] : memref<8x32xf32, #tpu.memory_space<vmem>>, vector<8x32xf32>
    tpu.vector_store %arg2[%c0_8, %c0_9], %21 {strides = array<i32>} : memref<8x32xf32, #tpu.memory_space<vmem>>, vector<8x32xf32>,
    return
  }
  func.func @transform_0(%arg0: i32) -> (i32, i32, i32) {
    %c0_i32 = arith.constant 0 : i32
    %c0_i32_0 = arith.constant 0 : i32
    %c0_i32_1 = arith.constant 0 : i32
    return %arg0, %c0_i32, %c0_i32_0 : i32, i32, i32
  }
  func.func @transform_1(%arg0: i32) -> (i32, i32) {
    %c0_i32 = arith.constant 0 : i32
    %c0_i32_0 = arith.constant 0 : i32
    return %arg0, %c0_i32 : i32, i32
  }
}

</mosaic_0001>

<bundles_post_ra>
// kernel: tpu_custom_call.1
= control target key start
LH: loop header
LB: loop body
LE: loop exit
PB: predicated region body
PF: predicated region fallthrough
CT: control target
= control target key end

     0   :  { %6 = vsyncpa [#allocation3], 0  ;;  %s287_s0 = inlined_call_operand.hbm [shape: f32[8,4,32], index: 0, kind: input, shape index: {}]   ;;  %s288_s1 = inlined_call_operand.hbm [shape: f32[8,32], index: 1, kind: output, shape index: {}]  }
   0x1   :  { %7 = vsyncpa [#allocation4], 0  ;;  %s12_s8 = sshll.u32 %s287_s0, 4  ;;  %s266_s9 = smov [#allocation2]   ;;  %s13_s8 = int_to_ptr.hbm [resolvable:$true] %s12_s8 }
   0x2   :  { %s14_s10 = sshll.u32 %s266_s9, 4  ;;  %s267_s11 = smov 64   ;;  %s15_s10 = int_to_ptr.vmem [resolvable:$true] %s14_s10 }
   0x3   :  { %s268_s12 = smov 4  }
   0x4   :  { %20 = dma.hbm_to_vmem [thread:$0]  %s13_s8, 512, %s15_s10, [#allocation3], %s267_s11, %s267_s11, %s268_s12  }
   0x5   :  { %262 = dma.done.wait [#allocation3], 512  }
   0x6   :  { %263 = vsyncadd [#allocation3], 4294966784  ;;  %v25_v0 = vld [vmem:[#allocation2] sm:$0x1]  ;;  %v26_v1 = vld [vmem:[#allocation2 + $0x4] sm:$0x1] }
   0x7   :  { %v27_v2 = vld [vmem:[#allocation2 + $0x8] sm:$0x1]  ;;  %v28_v3 = vld [vmem:[#allocation2 + $0xc] sm:$0x1]  ;;  %v29_v4 = vld [vmem:[#allocation2 + $0x10] sm:$0x1]  ;;  %v33_v6 = vmul.f32 %v25_v0, %v25_v0  ;;  %v34_v7 = vmul.f32 %v26_v1, %v26_v1 }
   0x8   :  { %v30_v5 = vld [vmem:[#allocation2 + $0x14] sm:$0x1]  ;;  %v31_v8 = vld [vmem:[#allocation2 + $0x18] sm:$0x1]  ;;  %v32_v9 = vld [vmem:[#allocation2 + $0x1c] sm:$0x1]  ;;  %v35_v10 = vmul.f32 %v27_v2, %v27_v2  ;;  %v36_v11 = vmul.f32 %v28_v3, %v28_v3  ;;  %v37_v12 = vmul.f32 %v29_v4, %v29_v4 }
   0x9   :  { %v38_v13 = vmul.f32 %v30_v5, %v30_v5  ;;  %v41_v14 = vld [vmem:[#allocation2 + $0x1] sm:$0x1]  ;;  %v39_v15 = vmul.f32 %v31_v8, %v31_v8  ;;  %v40_v16 = vmul.f32 %v32_v9, %v32_v9  ;;  %v42_v17 = vld [vmem:[#allocation2 + $0x5] sm:$0x1]  ;;  %v43_v18 = vld [vmem:[#allocation2 + $0x9] sm:$0x1] }
   0xa   :  { %v44_v19 = vld [vmem:[#allocation2 + $0xd] sm:$0x1]  ;;  %v49_v20 = vadd.f32 %v41_v14, %v25_v0  ;;  %v57_v21 = vmul.f32 %v41_v14, %v41_v14  ;;  %v45_v22 = vld [vmem:[#allocation2 + $0x11] sm:$0x1]  ;;  %v46_v23 = vld [vmem:[#allocation2 + $0x15] sm:$0x1]  ;;  %v50_v25 = vadd.f32 %v42_v17, %v26_v1  ;;  %v51_v26 = vadd.f32 %v43_v18, %v27_v2 }
   0xb   :  { %v47_v24 = vld [vmem:[#allocation2 + $0x19] sm:$0x1]  ;;  %v52_v27 = vadd.f32 %v44_v19, %v28_v3  ;;  %v58_v28 = vmul.f32 %v42_v17, %v42_v17  ;;  %v48_v29 = vld [vmem:[#allocation2 + $0x1d] sm:$0x1]  ;;  %v53_v30 = vadd.f32 %v45_v22, %v29_v4  ;;  %v54_v31 = vadd.f32 %v46_v23, %v30_v5  ;;  %v73_v38 = vld [vmem:[#allocation2 + $0x2] sm:$0x1] }
   0xc   :  { %v55_v32 = vadd.f32 %v47_v24, %v31_v8  ;;  %v59_v33 = vmul.f32 %v43_v18, %v43_v18  ;;  %v56_v34 = vadd.f32 %v48_v29, %v32_v9  ;;  %v60_v35 = vmul.f32 %v44_v19, %v44_v19  ;;  %v74_v39 = vld [vmem:[#allocation2 + $0x6] sm:$0x1]  ;;  %v75_v40 = vld [vmem:[#allocation2 + $0xa] sm:$0x1]  ;;  %v76_v45 = vld [vmem:[#allocation2 + $0xe] sm:$0x1] }
   0xd   :  { %v61_v36 = vmul.f32 %v45_v22, %v45_v22  ;;  %v62_v37 = vmul.f32 %v46_v23, %v46_v23  ;;  %v63_v41 = vmul.f32 %v47_v24, %v47_v24  ;;  %v64_v42 = vmul.f32 %v48_v29, %v48_v29  ;;  %v77_v46 = vld [vmem:[#allocation2 + $0x12] sm:$0x1]  ;;  %v78_v47 = vld [vmem:[#allocation2 + $0x16] sm:$0x1]  ;;  %v79_v52 = vld [vmem:[#allocation2 + $0x1a] sm:$0x1] }
   0xe   :  { %v65_v43 = vadd.f32 %v57_v21, %v33_v6  ;;  %v66_v44 = vadd.f32 %v58_v28, %v34_v7  ;;  %v67_v48 = vadd.f32 %v59_v33, %v35_v10  ;;  %v68_v49 = vadd.f32 %v60_v35, %v36_v11  ;;  %v80_v53 = vld [vmem:[#allocation2 + $0x1e] sm:$0x1]  ;;  %v105_v6 = vld [vmem:[#allocation2 + $0x3] sm:$0x1]  ;;  %v106_v7 = vld [vmem:[#allocation2 + $0x7] sm:$0x1] }
   0xf   :  { %v69_v50 = vadd.f32 %v61_v36, %v37_v12  ;;  %v70_v51 = vadd.f32 %v62_v37, %v38_v13  ;;  %v71_v54 = vadd.f32 %v63_v41, %v39_v15  ;;  %v72_v55 = vadd.f32 %v64_v42, %v40_v16  ;;  %v107_v8 = vld [vmem:[#allocation2 + $0xb] sm:$0x1]  ;;  %v108_v13 = vld [vmem:[#allocation2 + $0xf] sm:$0x1]  ;;  %v109_v14 = vld [vmem:[#allocation2 + $0x13] sm:$0x1] }
  0x10   :  { %v81_v56 = vadd.f32 %v73_v38, %v49_v20  ;;  %v82_v57 = vadd.f32 %v74_v39, %v50_v25  ;;  %v83_v58 = vadd.f32 %v75_v40, %v51_v26  ;;  %v84_v59 = vadd.f32 %v76_v45, %v52_v27  ;;  %v110_v15 = vld [vmem:[#allocation2 + $0x17] sm:$0x1]  ;;  %v111_v20 = vld [vmem:[#allocation2 + $0x1b] sm:$0x1]  ;;  %v112_v21 = vld [vmem:[#allocation2 + $0x1f] sm:$0x1] }
  0x11   :  { %v85_v60 = vadd.f32 %v77_v46, %v53_v30  ;;  %v86_v61 = vadd.f32 %v78_v47, %v54_v31  ;;  %v87_v62 = vadd.f32 %v79_v52, %v55_v32  ;;  %v88_v63 = vadd.f32 %v80_v53, %v56_v34  ;;  %s269_s0 = smov [#allocation5]   ;;  %s200_s16 = sshll.u32 %s288_s1, 4  ;;  %s201_s16 = int_to_ptr.hbm [resolvable:$true] %s200_s16 }
  0x12   :  { %v89_v0 = vmul.f32 %v73_v38, %v73_v38  ;;  %v90_v1 = vmul.f32 %v74_v39, %v74_v39  ;;  %v91_v2 = vmul.f32 %v75_v40, %v75_v40  ;;  %v92_v3 = vmul.f32 %v76_v45, %v76_v45  ;;  %s198_s13 = sshll.u32 %s269_s0, 4  ;;  %s199_s13 = int_to_ptr.vmem [resolvable:$true] %s198_s13 }
  0x13   :  { %v93_v4 = vmul.f32 %v77_v46, %v77_v46  ;;  %v94_v5 = vmul.f32 %v78_v47, %v78_v47  ;;  %v95_v9 = vmul.f32 %v79_v52, %v79_v52  ;;  %v96_v10 = vmul.f32 %v80_v53, %v80_v53 }
  0x14   :  { %v97_v11 = vadd.f32 %v89_v0, %v65_v43  ;;  %v98_v12 = vadd.f32 %v90_v1, %v66_v44  ;;  %v99_v16 = vadd.f32 %v91_v2, %v67_v48  ;;  %v100_v17 = vadd.f32 %v92_v3, %v68_v49 }
  0x15   :  { %v101_v18 = vadd.f32 %v93_v4, %v69_v50  ;;  %v102_v19 = vadd.f32 %v94_v5, %v70_v51  ;;  %v103_v22 = vadd.f32 %v95_v9, %v71_v54  ;;  %v104_v23 = vadd.f32 %v96_v10, %v72_v55 }
  0x16   :  { %v113_v24 = vadd.f32 %v105_v6, %v81_v56  ;;  %v114_v25 = vadd.f32 %v106_v7, %v82_v57  ;;  %v115_v26 = vadd.f32 %v107_v8, %v83_v58  ;;  %v116_v27 = vadd.f32 %v108_v13, %v84_v59 }
  0x17   :  { %v117_v28 = vadd.f32 %v109_v14, %v85_v60  ;;  %v118_v29 = vadd.f32 %v110_v15, %v86_v61  ;;  %v119_v30 = vadd.f32 %v111_v20, %v87_v62  ;;  %v120_v31 = vadd.f32 %v112_v21, %v88_v63 }
  0x18   :  { %v121_v32 = vmul.f32 %v105_v6, %v105_v6  ;;  %v122_v33 = vmul.f32 %v106_v7, %v106_v7  ;;  %v123_v34 = vmul.f32 %v107_v8, %v107_v8  ;;  %v124_v35 = vmul.f32 %v108_v13, %v108_v13 }
  0x19   :  { %v125_v36 = vmul.f32 %v109_v14, %v109_v14  ;;  %v126_v37 = vmul.f32 %v110_v15, %v110_v15  ;;  %vm170_vm0 = vcmask 1041409   ;;  %v127_v38 = vmul.f32 %v111_v20, %v111_v20 }
  0x1a   :  { %v128_v39 = vmul.f32 %v112_v21, %v112_v21  ;;  %v129_v40 = vadd.f32 %v121_v32, %v97_v11  ;;  %v130_v41 = vadd.f32 %v122_v33, %v98_v12  ;;  %v131_v42 = vadd.f32 %v123_v34, %v99_v16 }
  0x1b   :  { %v132_v43 = vadd.f32 %v124_v35, %v100_v17  ;;  %v133_v44 = vadd.f32 %v125_v36, %v101_v18  ;;  %v134_v45 = vadd.f32 %v126_v37, %v102_v19  ;;  %v135_v46 = vadd.f32 %v127_v38, %v103_v22 }
  0x1c   :  { %v136_v47 = vadd.f32 %v128_v39, %v104_v23  ;;  %v137_v48 = vmul.f32 %v113_v24, %v113_v24  ;;  %v138_v49 = vmul.f32 %v114_v25, %v114_v25  ;;  %v139_v50 = vmul.f32 %v115_v26, %v115_v26 }
  0x1d   :  { %v140_v51 = vmul.f32 %v116_v27, %v116_v27  ;;  %v141_v52 = vmul.f32 %v117_v28, %v117_v28  ;;  %v142_v53 = vmul.f32 %v118_v29, %v118_v29  ;;  %v143_v54 = vmul.f32 %v119_v30, %v119_v30 }
  0x1e   :  { %v144_v55 = vmul.f32 %v120_v31, %v120_v31  ;;  %v145_v56 = vsub.f32 %v137_v48, %v129_v40  ;;  %v146_v57 = vsub.f32 %v138_v49, %v130_v41  ;;  %v147_v58 = vsub.f32 %v139_v50, %v131_v42 }
  0x1f   :  { %v148_v59 = vsub.f32 %v140_v51, %v132_v43  ;;  %v149_v60 = vsub.f32 %v141_v52, %v133_v44  ;;  %v150_v61 = vsub.f32 %v142_v53, %v134_v45  ;;  %v151_v62 = vsub.f32 %v143_v54, %v135_v46 }
  0x20   :  { %v152_v63 = vsub.f32 %v144_v55, %v136_v47  ;;  %v153_v0 = vmul.f32 0.5, %v145_v56  ;;  %v154_v1 = vmul.f32 0.5, %v146_v57  ;;  %v155_v2 = vmul.f32 0.5, %v147_v58 }
  0x21   :  { %v156_v3 = vmul.f32 0.5, %v148_v59  ;;  %v157_v4 = vmul.f32 0.5, %v149_v60  ;;  %v158_v5 = vmul.f32 0.5, %v150_v61  ;;  %v159_v6 = vmul.f32 0.5, %v151_v62 }
  0x22   :  { %v160_v7 = vmul.f32 0.5, %v152_v63  ;;  %v169_v8 = vrot.slane %v154_v1, 7  ;;  %vm173_vm1 = vcmask 1042434   ;;  %v172_v9 = vrot.slane %v155_v2, 6 }
  0x23   :  { %v175_v10 = vrot.slane %v156_v3, 5  ;;  %vm176_vm2 = vcmask 1043459   ;;  %v178_v11 = vrot.slane %v157_v4, 4  ;;  %vm179_vm3 = vcmask 1044484  }
  0x24   :  { %v171_v12 = vsel %vm170_vm0, %v169_v8, %v153_v0  ;;  %v181_v13 = vrot.slane %v158_v5, 3  ;;  %vm182_vm4 = vcmask 1045509   ;;  %v184_v15 = vrot.slane %v159_v6, 2 }
  0x25   :  { %v174_v14 = vsel %vm173_vm1, %v172_v9, %v171_v12  ;;  %vm185_vm5 = vcmask 1046534   ;;  %v187_v17 = vrot.slane %v160_v7, 1  ;;  %vm188_vm6 = vcmask 1047559  }
  0x26   :  { %v177_v16 = vsel %vm176_vm2, %v175_v10, %v174_v14  ;;  %vm191_vm7 = vcmask 261120  }
  0x27   :  { %v180_v18 = vsel %vm179_vm3, %v178_v11, %v177_v16 }
  0x28   :  { %v183_v19 = vsel %vm182_vm4, %v181_v13, %v180_v18 }
  0x29   :  { %v186_v20 = vsel %vm185_vm5, %v184_v15, %v183_v19 }
  0x2a   :  { %v189_v21 = vsel %vm188_vm6, %v187_v17, %v186_v20 }
  0x2b   :  { %192 = vst.msk [vmem:[#allocation5] sm:$0xff] %vm191_vm7, %v189_v21 }
  0x2c   :  { %203 = dma.vmem_to_hbm [thread:$0]  %s199_s13, 128, %s201_s16, [#allocation4]  }
  0x2d   :  { %264 = dma.done.wait [#allocation4], 128  }
  0x2e   :  { %265 = vsyncadd [#allocation4], 4294967168 }
  0x2f   :  { %208 = vsyncpa [#allocation3], 1 }
  0x30   :  { %209 = vsyncpa [#allocation4], 1 }

</bundles_post_ra>
